<compile_context>
chip_gen: v7x
topology: tpu7x:2x2x1
jax: 0.10.0
libtpu: 0.0.40
codegen_flags: <defaults>
</compile_context>

<pallas_src>
import functools

import jax
import jax.numpy as jnp
from jax import lax
from jax.experimental import pallas as pl
from jax.experimental.pallas import tpu as pltpu

_LANE = 128        # lane width (last-dim grain)
_SUBLANE = 8       # sublane width for f32 (second-to-last-dim grain)
_NEG_BIG = -1e30   # acts as -inf for the masked softmax


def _round_up(x: int, m: int) -> int:
    return (x + m - 1) // m * m


def _pick_tb(batch: int) -> int:
    """Batch-tile policy (see header): tiny batches -> 1 tile; big batches ->
    >=2 grid steps (v7x megacore) with lane/sublane-dense tiles up to 512."""
    b8 = _round_up(batch, _SUBLANE)
    if b8 <= 256:
        return b8
    return min(512, _round_up(pl.cdiv(batch, 2), _SUBLANE))


# --------------------------------------------------------------------------- kernel
def _make_policy_value_kernel(num_hidden_slabs: int, F: int, F_r: int, H: int,
                              num_actions: int):
    """Fused MLP + fused actor/critic head + masked (exact) softmax.

    Operand layout (parameter packs may be f32 or bf16; all math accumulates f32):
      x_ref:    (TB, F)                 true-width input rows
      l0_ref:   (F_r+8, H)              rows [0:F) = W0, row F_r = b0
      hid_ref:  (L-1, H+8, H)           per-layer slab: rows [0:H) = W_i, row H = b_i
      head_ref: (H+8, P)                rows [0:H) = [Wa | Wc | 0], row H = [ba | bc | 0]
      out_ref:  (TB, P) f32             cols [0:A) = policy, col A = value, rest 0
    """

    def kernel(*refs):
        if num_hidden_slabs:
            x_ref, l0_ref, hid_ref, head_ref, out_ref = refs
        else:
            x_ref, l0_ref, head_ref, out_ref = refs
        mm_dt = l0_ref.dtype  # matmul-input dtype (f32 default; bf16 optional)

        h = x_ref[...].astype(jnp.float32)                       # (TB, F)

        # --- layer 0: true feature width, hidden padded to H ------------------
        w0 = l0_ref[:F, :]
        b0 = l0_ref[F_r:F_r + 1, :].astype(jnp.float32)
        h = jnp.maximum(
            jnp.dot(h.astype(mm_dt), w0, preferred_element_type=jnp.float32) + b0,
            0.0)                                                  # (TB, H) f32

        # --- remaining hidden layers ------------------------------------------
        if num_hidden_slabs:
            def layer(i, h):
                slab = hid_ref[i]                                 # (H+8, H)
                w = slab[:H, :]
                b = slab[H:H + 1, :].astype(jnp.float32)
                return jnp.maximum(
                    jnp.dot(h.astype(mm_dt), w,
                            preferred_element_type=jnp.float32) + b, 0.0)

            if num_hidden_slabs <= 4:
                # short & static -> unroll (LLO scheduler visibility)
                for i in range(num_hidden_slabs):
                    h = layer(i, h)
            else:
                # deep nets: bound vreg live ranges instead of unrolling
                h = lax.fori_loop(0, num_hidden_slabs, layer, h)

        # --- fused actor + critic head: one MXU push for both outputs ---------
        head = (jnp.dot(h.astype(mm_dt), head_ref[:H, :],
                        preferred_element_type=jnp.float32)
                + head_ref[H:H + 1, :].astype(jnp.float32))       # (TB, P) f32

        lane = lax.broadcasted_iota(jnp.int32, head.shape, 1)

        # Numerically-stable softmax restricted to the first `num_actions` lanes.
        logits = jnp.where(lane < num_actions, head, _NEG_BIG)
        m = jnp.max(logits, axis=-1, keepdims=True)
        e = jnp.exp(logits - m)                                   # padded lanes -> 0
        denom = jnp.sum(e, axis=-1, keepdims=True)
        policy = e / denom                 # EXACT divide -> rows sum to 1 (f32 rounding)

        # Single lane-dense store: policy on lanes < A, raw value on lane A, 0 after.
        out_ref[...] = jnp.where(lane == num_actions, head, policy)

    return kernel


# ----------------------------------------------------------------- params / packing
def init_params(key, num_features: int, num_actions: int, num_layers: int,
                hidden_sizes: int):
    """PyTorch-equivalent layer shapes; weights stored (in, out), biases (1, out)."""
    params = []
    in_dim = num_features
    for _ in range(num_layers):
        key, kw, kb = jax.random.split(key, 3)
        bound = 1.0 / float(in_dim) ** 0.5
        w = jax.random.uniform(kw, (in_dim, hidden_sizes), jnp.float32, -bound, bound)
        b = jax.random.uniform(kb, (1, hidden_sizes), jnp.float32, -bound, bound)
        params += [w, b]
        in_dim = hidden_sizes

    bound = 1.0 / float(hidden_sizes) ** 0.5
    key, kw, kb = jax.random.split(key, 3)
    wa = jax.random.uniform(kw, (hidden_sizes, num_actions), jnp.float32, -bound, bound)
    ba = jax.random.uniform(kb, (1, num_actions), jnp.float32, -bound, bound)
    key, kw, kb = jax.random.split(key, 3)
    wc = jax.random.uniform(kw, (hidden_sizes, 1), jnp.float32, -bound, bound)
    bc = jax.random.uniform(kb, (1, 1), jnp.float32, -bound, bound)
    params += [wa, ba, wc, bc]
    return params


def pack_params(params, num_features: int, num_actions: int, num_layers: int,
                hidden_sizes: int, dtype=jnp.float32):
    """Pack the network into three padded, lane/sublane-aligned operands (once, at
    init): layer0 slab sized around num_features, deeper layers around hidden, and
    a fused actor+critic head.  Zero-padding is exact (padded rows/cols/lanes all
    contribute exact zeros).  Use dtype=jnp.bfloat16 once hidden_sizes >= ~256
    (MXU-bound regime) -- accumulation stays f32 in the kernel."""
    F = num_features
    F_r = _round_up(F, _SUBLANE)
    H = _round_up(hidden_sizes, _LANE)
    P = _round_up(num_actions + 1, _LANE)

    w0, b0 = params[0], params[1]
    layer0_pack = jnp.zeros((F_r + _SUBLANE, H), dtype)
    layer0_pack = layer0_pack.at[:F, :hidden_sizes].set(w0.astype(dtype))
    layer0_pack = layer0_pack.at[F_r, :hidden_sizes].set(b0[0].astype(dtype))

    if num_layers > 1:
        hidden_pack = jnp.zeros((num_layers - 1, H + _SUBLANE, H), dtype)
        for i in range(1, num_layers):
            w, b = params[2 * i], params[2 * i + 1]
            hidden_pack = hidden_pack.at[i - 1, :hidden_sizes, :hidden_sizes].set(
                w.astype(dtype))
            hidden_pack = hidden_pack.at[i - 1, H, :hidden_sizes].set(b[0].astype(dtype))
    else:
        hidden_pack = None

    wa, ba, wc, bc = params[2 * num_layers: 2 * num_layers + 4]
    w_head = jnp.concatenate([wa, wc], axis=1)   # (hidden, A + 1)
    b_head = jnp.concatenate([ba, bc], axis=1)   # (1, A + 1)
    head_pack = jnp.zeros((H + _SUBLANE, P), dtype)
    head_pack = head_pack.at[:hidden_sizes, :num_actions + 1].set(w_head.astype(dtype))
    head_pack = head_pack.at[H, :num_actions + 1].set(b_head[0].astype(dtype))
    return layer0_pack, hidden_pack, head_pack


# -------------------------------------------------------------------------- forward
@functools.partial(jax.jit, static_argnames=("num_actions", "single_buffer_params"))
def policy_value_forward(x, layer0_pack, hidden_pack, head_pack, *, num_actions: int,
                         single_buffer_params: bool = True):
    batch, F = x.shape
    F_r = layer0_pack.shape[0] - _SUBLANE
    H = layer0_pack.shape[1]
    P = head_pack.shape[1]
    num_hidden_slabs = 0 if hidden_pack is None else hidden_pack.shape[0]

    # Batch-only padding; the feature dim passes through at its true width.
    TB = _pick_tb(batch)
    B_pad = _round_up(batch, TB)
    x_in = x if B_pad == batch else jnp.pad(x, ((0, B_pad - batch), (0, 0)))

    kernel = _make_policy_value_kernel(num_hidden_slabs, F, F_r, H, num_actions)

    def _param_spec(shape):
        idx_map = lambda i, _nd=len(shape): (0,) * _nd
        if single_buffer_params:
            # Constant index map -> no "next" block ever needed; single buffer
            # halves the resident pack footprint in VMEM.
            return pl.BlockSpec(shape, idx_map, pipeline_mode=pl.Buffered(1))
        return pl.BlockSpec(shape, idx_map)

    in_specs = [pl.BlockSpec((TB, F), lambda i: (i, 0)),
                _param_spec(layer0_pack.shape)]
    operands = [x_in, layer0_pack]
    if num_hidden_slabs:
        in_specs.append(_param_spec(hidden_pack.shape))
        operands.append(hidden_pack)
    in_specs.append(_param_spec(head_pack.shape))
    operands.append(head_pack)

    # Explicit VMEM budget: double-buffered x/out tiles + live hidden activation
    # + parameter packs (+ slack).  Never below the default scoped limit, capped
    # at v7x's 64 MiB physical VMEM.
    pack_bytes = (layer0_pack.size
                  + (hidden_pack.size if hidden_pack is not None else 0)
                  + head_pack.size) * layer0_pack.dtype.itemsize
    bufs = 1 if single_buffer_params else 2
    needed = (2 * TB * F * 4 + 2 * TB * P * 4 + 2 * TB * H * 4
              + bufs * pack_bytes + (4 << 20))
    vmem_limit = int(min(max(needed, 32 << 20), 64 << 20))

    out = pl.pallas_call(
        kernel,
        out_shape=jax.ShapeDtypeStruct((B_pad, P), jnp.float32),
        grid_spec=pltpu.PrefetchScalarGridSpec(
            num_scalar_prefetch=0,
            grid=(B_pad // TB,),
            in_specs=in_specs,
            out_specs=pl.BlockSpec((TB, P), lambda i: (i, 0)),
        ),
        compiler_params=pltpu.CompilerParams(
            dimension_semantics=("parallel",),
            vmem_limit_bytes=vmem_limit,
        ),
    )(*operands)

    policy = out[:batch, :num_actions]
    values = out[:batch, num_actions:num_actions + 1]
    return policy, values


# ------------------------------------------------------------------------ reference
def reference_forward(x, params, num_layers):
    """Pure-JAX reference (mirrors the PyTorch forward)."""
    h = x
    idx = 0
    for _ in range(num_layers):
        w, b = params[idx], params[idx + 1]
        idx += 2
        h = jnp.maximum(h @ w + b, 0.0)
    wa, ba, wc, bc = params[idx:idx + 4]
    logits = h @ wa + ba
    policy = jax.nn.softmax(logits, axis=-1)
    values = h @ wc + bc
    return policy, values


if __name__ == "__main__":
    batch = 8
    num_features = 16
    num_actions = 4
    num_layers = 2
    hidden_sizes = 32

    key = jax.random.PRNGKey(0)
    key, kx, kp = jax.random.split(key, 3)

    x = jax.random.normal(kx, (batch, num_features), jnp.float32)
    params = init_params(kp, num_features, num_actions, num_layers, hidden_sizes)
    layer0_pack, hidden_pack, head_pack = pack_params(
        params, num_features, num_actions, num_layers, hidden_sizes)

    ref_policy, ref_values = reference_forward(x, params, num_layers)

    def _run(single_buffer):
        p, v = policy_value_forward(
            x, layer0_pack, hidden_pack, head_pack,
            num_actions=num_actions, single_buffer_params=single_buffer)
        p = jax.block_until_ready(p)
        v = jax.block_until_ready(v)
        if not (bool(jnp.allclose(v, ref_values, atol=1e-5, rtol=1e-5)) and
                bool(jnp.allclose(p, ref_policy, atol=1e-5, rtol=1e-4))):
            raise AssertionError("mismatch vs reference")
        return p, v

    try:
        # Preferred path: single-buffered (pl.Buffered(1)) parameter packs.
        policy, values = _run(True)
    except Exception:
        # Fallback if this jax/backend rejects single-buffered pipeline_mode.
        policy, values = _run(False)

    assert policy.shape == (batch, num_actions)
    assert values.shape == (batch, 1)
    assert jnp.allclose(values, ref_values, atol=1e-5, rtol=1e-5)
    assert jnp.allclose(policy, ref_policy, atol=1e-5, rtol=1e-4)
    # exact division in the kernel -> rows sum to 1 up to f32 rounding
    assert jnp.allclose(jnp.sum(policy, axis=-1), 1.0, atol=1e-5)

    print("KERNEL_OK")
</pallas_src>

<mosaic_0001>
module attributes {stable_mosaic.version = 11 : i64} {
  func.func @kernel(%arg0: i32, %arg1: memref<8x16xf32, #tpu.memory_space<vmem>>, %arg2: memref<24x128xf32, #tpu.memory_space<vmem>>, %arg3: memref<1x136x128xf32, #tpu.memory_space<vmem>>, %arg4: memref<136x128xf32, #tpu.memory_space<vmem>>, %arg5: memref<8x128xf32, #tpu.memory_space<vmem>>) attributes {dimension_semantics = [#tpu.dimension_semantics<parallel>], iteration_bounds = array<i64: 1>, scalar_prefetch = 0 : i64, scratch_operands = 0 : i64, tpu.core_type = #tpu.core_type<tc>, window_params = [{transform_indices = @transform_0, window_bounds = array<i64: 8, 16>}, {pipeline_mode = #tpu.pipeline_mode<synchronous>, transform_indices = @transform_1, window_bounds = array<i64: 24, 128>}, {pipeline_mode = #tpu.pipeline_mode<synchronous>, transform_indices = @transform_2, window_bounds = array<i64: 1, 136, 128>}, {pipeline_mode = #tpu.pipeline_mode<synchronous>, transform_indices = @transform_3, window_bounds = array<i64: 136, 128>}, {transform_indices = @transform_4, window_bounds = array<i64: 8, 128>}]} {
    %c0 = arith.constant 0 : index
    %c0_0 = arith.constant 0 : index
    %0 = vector.load %arg1[%c0, %c0_0] : memref<8x16xf32, #tpu.memory_space<vmem>>, vector<8x16xf32>
    %c0_1 = arith.constant 0 : index
    %c0_2 = arith.constant 0 : index
    %1 = vector.load %arg2[%c0_1, %c0_2] : memref<24x128xf32, #tpu.memory_space<vmem>>, vector<16x128xf32>
    %c16 = arith.constant 16 : index
    %c0_3 = arith.constant 0 : index
    %2 = vector.load %arg2[%c16, %c0_3] : memref<24x128xf32, #tpu.memory_space<vmem>>, vector<1x128xf32>
    %cst = arith.constant dense<0.000000e+00> : vector<8x128xf32>
    %3 = tpu.matmul %0, %1, %cst {dimension_numbers = #tpu.dot_dimension_numbers<[1], [0], [0], [1], [0, 0, 1, 1], [], []>} : vector<8x16xf32>, vector<16x128xf32>, vector<8x128xf32> -> vector<8x128xf32>
    %4 = vector.broadcast %2 : vector<1x128xf32> to vector<8x128xf32>
    %5 = arith.addf %3, %4 : vector<8x128xf32>
    %cst_4 = arith.constant 0.000000e+00 : f32
    %6 = vector.broadcast %cst_4 : f32 to vector<8x128xf32>
    %7 = arith.maximumf %5, %6 : vector<8x128xf32>
    %c0_5 = arith.constant 0 : index
    %c0_6 = arith.constant 0 : index
    %c0_7 = arith.constant 0 : index
    %8 = vector.load %arg3[%c0_5, %c0_6, %c0_7] : memref<1x136x128xf32, #tpu.memory_space<vmem>>, vector<1x136x128xf32>
    %9 = vector.shape_cast %8 : vector<1x136x128xf32> to vector<136x128xf32>
    %10 = vector.extract_strided_slice %9 {offsets = [0, 0], sizes = [128, 128], strides = [1, 1]} : vector<136x128xf32> to vector<128x128xf32>
    %11 = vector.extract_strided_slice %9 {offsets = [128, 0], sizes = [1, 128], strides = [1, 1]} : vector<136x128xf32> to vector<1x128xf32>
    %cst_8 = arith.constant dense<0.000000e+00> : vector<8x128xf32>
    %12 = tpu.matmul %7, %10, %cst_8 {dimension_numbers = #tpu.dot_dimension_numbers<[1], [0], [0], [1], [0, 0, 1, 1], [], []>} : vector<8x128xf32>, vector<128x128xf32>, vector<8x128xf32> -> vector<8x128xf32>
    %13 = vector.broadcast %11 : vector<1x128xf32> to vector<8x128xf32>
    %14 = arith.addf %12, %13 : vector<8x128xf32>
    %cst_9 = arith.constant 0.000000e+00 : f32
    %15 = vector.broadcast %cst_9 : f32 to vector<8x128xf32>
    %16 = arith.maximumf %14, %15 : vector<8x128xf32>
    %c0_10 = arith.constant 0 : index
    %c0_11 = arith.constant 0 : index
    %17 = vector.load %arg4[%c0_10, %c0_11] : memref<136x128xf32, #tpu.memory_space<vmem>>, vector<128x128xf32>
    %cst_12 = arith.constant dense<0.000000e+00> : vector<8x128xf32>
    %18 = tpu.matmul %16, %17, %cst_12 {dimension_numbers = #tpu.dot_dimension_numbers<[1], [0], [0], [1], [0, 0, 1, 1], [], []>} : vector<8x128xf32>, vector<128x128xf32>, vector<8x128xf32> -> vector<8x128xf32>
    %c128 = arith.constant 128 : index
    %c0_13 = arith.constant 0 : index
    %19 = vector.load %arg4[%c128, %c0_13] : memref<136x128xf32, #tpu.memory_space<vmem>>, vector<1x128xf32>
    %20 = vector.broadcast %19 : vector<1x128xf32> to vector<8x128xf32>
    %21 = arith.addf %18, %20 : vector<8x128xf32>
    %22 = tpu.iota {dimensions = array<i32: 1>} : vector<8x128xi32>
    %c4_i32 = arith.constant 4 : i32
    %23 = vector.broadcast %c4_i32 : i32 to vector<8x128xi32>
    %24 = arith.cmpi slt, %22, %23 : vector<8x128xi32>
    %cst_14 = arith.constant -1.000000e+30 : f32
    %25 = vector.broadcast %cst_14 : f32 to vector<8x128xf32>
    %26 = arith.select %24, %21, %25 : vector<8x128xi1>, vector<8x128xf32>
    %cst_15 = arith.constant dense<0xFF800000> : vector<8xf32>
    %27 = vector.multi_reduction <maximumf>, %26, %cst_15 [1] : vector<8x128xf32> to vector<8xf32>
    %28 = vector.shape_cast %27 : vector<8xf32> to vector<8x1xf32>
    %29 = vector.broadcast %28 : vector<8x1xf32> to vector<8x128xf32>
    %30 = arith.subf %26, %29 : vector<8x128xf32>
    %31 = math.exp %30 : vector<8x128xf32>
    %cst_16 = arith.constant dense<0.000000e+00> : vector<8xf32>
    %32 = vector.multi_reduction <add>, %31, %cst_16 [1] : vector<8x128xf32> to vector<8xf32>
    %33 = vector.shape_cast %32 : vector<8xf32> to vector<8x1xf32>
    %34 = vector.broadcast %33 : vector<8x1xf32> to vector<8x128xf32>
    %35 = arith.divf %31, %34 : vector<8x128xf32>
    %c4_i32_17 = arith.constant 4 : i32
    %36 = vector.broadcast %c4_i32_17 : i32 to vector<8x128xi32>
    %37 = arith.cmpi eq, %22, %36 : vector<8x128xi32>
    %38 = arith.select %37, %21, %35 : vector<8x128xi1>, vector<8x128xf32>
    %c0_18 = arith.constant 0 : index
    %c0_19 = arith.constant 0 : index
    %39 = vector.load %arg5[%c0_18, %c0_19] : memref<8x128xf32, #tpu.memory_space<vmem>>, vector<8x128xf32>
    tpu.vector_store %arg5[%c0_18, %c0_19], %38 {strides = array<i32>} : memref<8x128xf32, #tpu.memory_space<vmem>>, vector<8x128xf32>,
    return
  }
  func.func @transform_0(%arg0: i32) -> (i32, i32) {
    %c0_i32 = arith.constant 0 : i32
    %c0_i32_0 = arith.constant 0 : i32
    return %arg0, %c0_i32 : i32, i32
  }
  func.func @transform_1(%arg0: i32) -> (i32, i32) {
    %c0_i32 = arith.constant 0 : i32
    %c0_i32_0 = arith.constant 0 : i32
    %c0_i32_1 = arith.constant 0 : i32
    return %c0_i32, %c0_i32_0 : i32, i32
  }
  func.func @transform_2(%arg0: i32) -> (i32, i32, i32) {
    %c0_i32 = arith.constant 0 : i32
    %c0_i32_0 = arith.constant 0 : i32
    %c0_i32_1 = arith.constant 0 : i32
    %c0_i32_2 = arith.constant 0 : i32
    return %c0_i32, %c0_i32_0, %c0_i32_1 : i32, i32, i32
  }
  func.func @transform_3(%arg0: i32) -> (i32, i32) {
    %c0_i32 = arith.constant 0 : i32
    %c0_i32_0 = arith.constant 0 : i32
    %c0_i32_1 = arith.constant 0 : i32
    return %c0_i32, %c0_i32_0 : i32, i32
  }
  func.func @transform_4(%arg0: i32) -> (i32, i32) {
    %c0_i32 = arith.constant 0 : i32
    %c0_i32_0 = arith.constant 0 : i32
    return %arg0, %c0_i32 : i32, i32
  }
}

module attributes {stable_mosaic.version = 11 : i64} {
  func.func @kernel(%arg0: i32, %arg1: memref<8x16xf32, #tpu.memory_space<vmem>>, %arg2: memref<24x128xf32, #tpu.memory_space<vmem>>, %arg3: memref<1x136x128xf32, #tpu.memory_space<vmem>>, %arg4: memref<136x128xf32, #tpu.memory_space<vmem>>, %arg5: memref<8x128xf32, #tpu.memory_space<vmem>>) attributes {dimension_semantics = [#tpu.dimension_semantics<parallel>], iteration_bounds = array<i64: 1>, scalar_prefetch = 0 : i64, scratch_operands = 0 : i64, tpu.core_type = #tpu.core_type<tc>, window_params = [{transform_indices = @transform_0, window_bounds = array<i64: 8, 16>}, {pipeline_mode = #tpu.pipeline_mode<synchronous>, transform_indices = @transform_1, window_bounds = array<i64: 24, 128>}, {pipeline_mode = #tpu.pipeline_mode<synchronous>, transform_indices = @transform_2, window_bounds = array<i64: 1, 136, 128>}, {pipeline_mode = #tpu.pipeline_mode<synchronous>, transform_indices = @transform_3, window_bounds = array<i64: 136, 128>}, {transform_indices = @transform_4, window_bounds = array<i64: 8, 128>}]} {
    %c0 = arith.constant 0 : index
    %c0_0 = arith.constant 0 : index
    %0 = vector.load %arg1[%c0, %c0_0] : memref<8x16xf32, #tpu.memory_space<vmem>>, vector<8x16xf32>
    %c0_1 = arith.constant 0 : index
    %c0_2 = arith.constant 0 : index
    %1 = vector.load %arg2[%c0_1, %c0_2] : memref<24x128xf32, #tpu.memory_space<vmem>>, vector<16x128xf32>
    %c16 = arith.constant 16 : index
    %c0_3 = arith.constant 0 : index
    %2 = vector.load %arg2[%c16, %c0_3] : memref<24x128xf32, #tpu.memory_space<vmem>>, vector<1x128xf32>
    %cst = arith.constant dense<0.000000e+00> : vector<8x128xf32>
    %3 = tpu.matmul %0, %1, %cst {dimension_numbers = #tpu.dot_dimension_numbers<[1], [0], [0], [1], [0, 0, 1, 1], [], []>} : vector<8x16xf32>, vector<16x128xf32>, vector<8x128xf32> -> vector<8x128xf32>
    %4 = vector.broadcast %2 : vector<1x128xf32> to vector<8x128xf32>
    %5 = arith.addf %3, %4 : vector<8x128xf32>
    %cst_4 = arith.constant 0.000000e+00 : f32
    %6 = vector.broadcast %cst_4 : f32 to vector<8x128xf32>
    %7 = arith.maximumf %5, %6 : vector<8x128xf32>
    %c0_5 = arith.constant 0 : index
    %c0_6 = arith.constant 0 : index
    %c0_7 = arith.constant 0 : index
    %8 = vector.load %arg3[%c0_5, %c0_6, %c0_7] : memref<1x136x128xf32, #tpu.memory_space<vmem>>, vector<1x136x128xf32>
    %9 = vector.shape_cast %8 : vector<1x136x128xf32> to vector<136x128xf32>
    %10 = vector.extract_strided_slice %9 {offsets = [0, 0], sizes = [128, 128], strides = [1, 1]} : vector<136x128xf32> to vector<128x128xf32>
    %11 = vector.extract_strided_slice %9 {offsets = [128, 0], sizes = [1, 128], strides = [1, 1]} : vector<136x128xf32> to vector<1x128xf32>
    %cst_8 = arith.constant dense<0.000000e+00> : vector<8x128xf32>
    %12 = tpu.matmul %7, %10, %cst_8 {dimension_numbers = #tpu.dot_dimension_numbers<[1], [0], [0], [1], [0, 0, 1, 1], [], []>} : vector<8x128xf32>, vector<128x128xf32>, vector<8x128xf32> -> vector<8x128xf32>
    %13 = vector.broadcast %11 : vector<1x128xf32> to vector<8x128xf32>
    %14 = arith.addf %12, %13 : vector<8x128xf32>
    %cst_9 = arith.constant 0.000000e+00 : f32
    %15 = vector.broadcast %cst_9 : f32 to vector<8x128xf32>
    %16 = arith.maximumf %14, %15 : vector<8x128xf32>
    %c0_10 = arith.constant 0 : index
    %c0_11 = arith.constant 0 : index
    %17 = vector.load %arg4[%c0_10, %c0_11] : memref<136x128xf32, #tpu.memory_space<vmem>>, vector<128x128xf32>
    %cst_12 = arith.constant dense<0.000000e+00> : vector<8x128xf32>
    %18 = tpu.matmul %16, %17, %cst_12 {dimension_numbers = #tpu.dot_dimension_numbers<[1], [0], [0], [1], [0, 0, 1, 1], [], []>} : vector<8x128xf32>, vector<128x128xf32>, vector<8x128xf32> -> vector<8x128xf32>
    %c128 = arith.constant 128 : index
    %c0_13 = arith.constant 0 : index
    %19 = vector.load %arg4[%c128, %c0_13] : memref<136x128xf32, #tpu.memory_space<vmem>>, vector<1x128xf32>
    %20 = vector.broadcast %19 : vector<1x128xf32> to vector<8x128xf32>
    %21 = arith.addf %18, %20 : vector<8x128xf32>
    %22 = tpu.iota {dimensions = array<i32: 1>} : vector<8x128xi32>
    %c4_i32 = arith.constant 4 : i32
    %23 = vector.broadcast %c4_i32 : i32 to vector<8x128xi32>
    %24 = arith.cmpi slt, %22, %23 : vector<8x128xi32>
    %cst_14 = arith.constant -1.000000e+30 : f32
    %25 = vector.broadcast %cst_14 : f32 to vector<8x128xf32>
    %26 = arith.select %24, %21, %25 : vector<8x128xi1>, vector<8x128xf32>
    %cst_15 = arith.constant dense<0xFF800000> : vector<8xf32>
    %27 = vector.multi_reduction <maximumf>, %26, %cst_15 [1] : vector<8x128xf32> to vector<8xf32>
    %28 = vector.shape_cast %27 : vector<8xf32> to vector<8x1xf32>
    %29 = vector.broadcast %28 : vector<8x1xf32> to vector<8x128xf32>
    %30 = arith.subf %26, %29 : vector<8x128xf32>
    %31 = math.exp %30 : vector<8x128xf32>
    %cst_16 = arith.constant dense<0.000000e+00> : vector<8xf32>
    %32 = vector.multi_reduction <add>, %31, %cst_16 [1] : vector<8x128xf32> to vector<8xf32>
    %33 = vector.shape_cast %32 : vector<8xf32> to vector<8x1xf32>
    %34 = vector.broadcast %33 : vector<8x1xf32> to vector<8x128xf32>
    %35 = arith.divf %31, %34 : vector<8x128xf32>
    %c4_i32_17 = arith.constant 4 : i32
    %36 = vector.broadcast %c4_i32_17 : i32 to vector<8x128xi32>
    %37 = arith.cmpi eq, %22, %36 : vector<8x128xi32>
    %38 = arith.select %37, %21, %35 : vector<8x128xi1>, vector<8x128xf32>
    %c0_18 = arith.constant 0 : index
    %c0_19 = arith.constant 0 : index
    %39 = vector.load %arg5[%c0_18, %c0_19] : memref<8x128xf32, #tpu.memory_space<vmem>>, vector<8x128xf32>
    tpu.vector_store %arg5[%c0_18, %c0_19], %38 {strides = array<i32>} : memref<8x128xf32, #tpu.memory_space<vmem>>, vector<8x128xf32>,
    return
  }
  func.func @transform_0(%arg0: i32) -> (i32, i32) {
    %c0_i32 = arith.constant 0 : i32
    %c0_i32_0 = arith.constant 0 : i32
    return %arg0, %c0_i32 : i32, i32
  }
  func.func @transform_1(%arg0: i32) -> (i32, i32) {
    %c0_i32 = arith.constant 0 : i32
    %c0_i32_0 = arith.constant 0 : i32
    %c0_i32_1 = arith.constant 0 : i32
    return %c0_i32, %c0_i32_0 : i32, i32
  }
  func.func @transform_2(%arg0: i32) -> (i32, i32, i32) {
    %c0_i32 = arith.constant 0 : i32
    %c0_i32_0 = arith.constant 0 : i32
    %c0_i32_1 = arith.constant 0 : i32
    %c0_i32_2 = arith.constant 0 : i32
    return %c0_i32, %c0_i32_0, %c0_i32_1 : i32, i32, i32
  }
  func.func @transform_3(%arg0: i32) -> (i32, i32) {
    %c0_i32 = arith.constant 0 : i32
    %c0_i32_0 = arith.constant 0 : i32
    %c0_i32_1 = arith.constant 0 : i32
    return %c0_i32, %c0_i32_0 : i32, i32
  }
  func.func @transform_4(%arg0: i32) -> (i32, i32) {
    %c0_i32 = arith.constant 0 : i32
    %c0_i32_0 = arith.constant 0 : i32
    return %arg0, %c0_i32 : i32, i32
  }
}

</mosaic_0001>

<bundles_post_ra>
// kernel: policy_value_forward.1
= control target key start
LH: loop header
LB: loop body
LE: loop exit
PB: predicated region body
PF: predicated region fallthrough
CT: control target
= control target key end

     0   :  { %9 = vsyncpa [#allocation3], 0  ;;  %s748_s0 = inlined_call_operand.hbm [shape: f32[8,16], index: 0, kind: input, shape index: {}]   ;;  %s749_s1 = inlined_call_operand.hbm [shape: f32[24,128], index: 1, kind: input, shape index: {}]   ;;  %s750_s2 = inlined_call_operand.hbm [shape: f32[1,136,128], index: 2, kind: input, shape index: {}]   ;;  %s751_s3 = inlined_call_operand.hbm [shape: f32[136,128], index: 3, kind: input, shape index: {}]   ;;  %s752_s4 = inlined_call_operand.vmem [shape: f32[8,128], index: 4, kind: output, shape index: {}]  }
   0x1   :  { %10 = vsyncpa [#allocation5], 0 }
   0x2   :  { %11 = vsyncpa [#allocation8], 0  ;;  %s634_s15 = smov [#allocation4]   ;;  %s540_s19 = scalar_lea.hbm %s749_s1, 384 }
   0x3   :  { %s27_s16 = sshll.u32 %s634_s15, 4  ;;  %p541_p0 = scmp.ne.s32.totalorder %s749_s1, %s540_s19  ;;  %s28_s16 = int_to_ptr.vmem [resolvable:$true] %s27_s16 }
   0x4   :  { %p544_p1 = scmp.lt.u32.totalorder %s540_s19, %s749_s1 }
   0x6   :  { %p546_p2 = pnand %p544_p1, %p541_p0 }
   0x8   :  { %549 = shalt.err (!%p546_p2)
}
   0x9   :  { %s550_s24 = scalar_lea.vmem %s28_s16, 384  ;;  %p555_p4 = scmp.lt.s32.totalorder %s28_s16, %s28_s16 }
   0xa   :  { %p551_p3 = scmp.ne.s32.totalorder %s28_s16, %s550_s24  ;;  %p556_p5 = scmp.lt.s32.totalorder %s550_s24, %s550_s24 }
   0xc   :  { %p557_p6 = por %p556_p5, %p555_p4 }
   0xe   :  { %p558_p7 = pnand %p557_p6, %p551_p3 }
  0x10   :  { %561 = shalt.err (!%p558_p7)
}
  0x11   :  { %s635_s25 = smov 128   ;;  %s636_s26 = smov 8  }
  0x12   :  { %33 = dma.hbm_to_vmem [thread:$0]  %s749_s1, 384, %s28_s16, [#allocation5], %s635_s25, %s635_s25, %s636_s26  }
  0x13   :  { %s637_s29 = smov [#allocation2]   ;;  %s638_s5 = smov [#allocation6]  }
  0x14   :  { %s18_s30 = sshll.u32 %s637_s29, 4  ;;  %s39_s6 = sshll.u32 %s638_s5, 4  ;;  %s19_s30 = int_to_ptr.vmem [resolvable:$true] %s18_s30  ;;  %s40_s6 = int_to_ptr.vmem [resolvable:$true] %s39_s6 }
  0x15   :  { %s562_s9 = scalar_lea.hbm %s748_s0, 128 }
  0x16   :  { %p563_p8 = scmp.ne.s32.totalorder %s748_s0, %s562_s9  ;;  %p566_p9 = scmp.lt.u32.totalorder %s562_s9, %s748_s0 }
  0x18   :  { %p568_p10 = pnand %p566_p9, %p563_p8 }
  0x1a   :  { %571 = shalt.err (!%p568_p10)
}
  0x1b   :  { %s572_s1 = scalar_lea.vmem %s19_s30, 128  ;;  %p577_p12 = scmp.lt.s32.totalorder %s19_s30, %s19_s30 }
  0x1c   :  { %p573_p11 = scmp.ne.s32.totalorder %s19_s30, %s572_s1  ;;  %p578_p13 = scmp.lt.s32.totalorder %s572_s1, %s572_s1 }
  0x1e   :  { %p579_p0 = por %p578_p13, %p577_p12 }
  0x20   :  { %p580_p1 = pnand %p579_p0, %p573_p11 }
  0x22   :  { %583 = shalt.err (!%p580_p1)
}
  0x23   :  { %21 = dma.hbm_to_vmem [thread:$0]  %s748_s0, 128, %s19_s30, [#allocation3]  }
  0x24   :  { %s584_s18 = scalar_lea.hbm %s750_s2, 2176 }
  0x25   :  { %p585_p2 = scmp.ne.s32.totalorder %s750_s2, %s584_s18  ;;  %p588_p3 = scmp.lt.u32.totalorder %s584_s18, %s750_s2 }
  0x27   :  { %p590_p4 = pnand %p588_p3, %p585_p2 }
  0x29   :  { %593 = shalt.err (!%p590_p4)
}
  0x2a   :  { %s594_s23 = scalar_lea.vmem %s40_s6, 2176  ;;  %p599_p6 = scmp.lt.s32.totalorder %s40_s6, %s40_s6 }
  0x2b   :  { %p595_p5 = scmp.ne.s32.totalorder %s40_s6, %s594_s23  ;;  %p600_p7 = scmp.lt.s32.totalorder %s594_s23, %s594_s23 }
  0x2d   :  { %p601_p8 = por %p600_p7, %p599_p6 }
  0x2f   :  { %p602_p9 = pnand %p601_p8, %p595_p5 }
  0x31   :  { %605 = shalt.err (!%p602_p9)
}
  0x32   :  { %45 = dma.hbm_to_vmem [thread:$0]  %s750_s2, 2176, %s40_s6, [#allocation5], %s635_s25, %s635_s25, %s636_s26  }
  0x33   :  { %s639_s27 = smov [#allocation7]   ;;  %s606_s5 = scalar_lea.hbm %s751_s3, 2176 }
  0x34   :  { %s51_s28 = sshll.u32 %s639_s27, 4  ;;  %p607_p10 = scmp.ne.s32.totalorder %s751_s3, %s606_s5  ;;  %s52_s28 = int_to_ptr.vmem [resolvable:$true] %s51_s28 }
  0x35   :  { %p610_p11 = scmp.lt.u32.totalorder %s606_s5, %s751_s3 }
  0x37   :  { %p612_p12 = pnand %p610_p11, %p607_p10 }
  0x39   :  { %615 = shalt.err (!%p612_p12)
}
  0x3a   :  { %s616_s11 = scalar_lea.vmem %s52_s28, 2176  ;;  %p621_p0 = scmp.lt.s32.totalorder %s52_s28, %s52_s28 }
  0x3b   :  { %p617_p13 = scmp.ne.s32.totalorder %s52_s28, %s616_s11  ;;  %p622_p1 = scmp.lt.s32.totalorder %s616_s11, %s616_s11 }
  0x3d   :  { %p623_p2 = por %p622_p1, %p621_p0 }
  0x3f   :  { %p624_p3 = pnand %p623_p2, %p617_p13 }
  0x41   :  { %627 = shalt.err (!%p624_p3)
}
  0x42   :  { %57 = dma.hbm_to_vmem [thread:$0]  %s751_s3, 2176, %s52_s28, [#allocation8], %s635_s25, %s635_s25, %s636_s26  }
  0x43   :  { %628 = dma.done.wait [#allocation3], 128  }
  0x44   :  { %629 = vsyncadd [#allocation3], 4294967168 }
  0x45   :  { %630 = dma.done.wait [#allocation5], 2560  }
  0x46   :  { %631 = vsyncadd [#allocation5], 4294964736 }
  0x47   :  { %632 = dma.done.wait [#allocation8], 2176  }
  0x48   :  { %633 = vsyncadd [#allocation8], 4294965120  ;;  %v640_v0 = vmov 0.0|0.0   ;;  %vm641_vm0 = vmmov 0   ;;  %v642_v1 = vmov 0.0   ;;  %v71_v2 = vld [vmem:[#allocation4] sm:$0xff]  ;;  %v170_v59 = vlaneseq }
  0x49   :  { %476 = vmatprep.subr.bf16.mxu0 %v640_v0  ;;  %403 = vmatprep.mubr.msk.f32.mxu0 %vm641_vm0, %v642_v1  ;;  %v72_v3 = vld [vmem:[#allocation4 + $0x8] sm:$0xff]  ;;  %v153_v5 = vld [vmem:[#allocation6] sm:$0xff]  ;;  %v154_v6 = vld [vmem:[#allocation6 + $0x8] sm:$0xff]  ;;  %vm78_vm1 = vcmask 130048  }
  0x4a   :  { %479 = vmatprep.subr.bf16.mxu1 %v640_v0  ;;  %438 = vmatprep.mubr.msk.f32.mxu1 %vm641_vm0, %v642_v1  ;;  %v477_v4 = vpack.c.bf16 %v72_v3, %v71_v2  ;;  %v155_v7 = vld [vmem:[#allocation6 + $0x10] sm:$0xff]  ;;  %v480_v8 = vpack.c.bf16 %v154_v6, %v153_v5  ;;  %v156_v9 = vld [vmem:[#allocation6 + $0x18] sm:$0xff]  ;;  %v70_v10 = vld [vmem:[#allocation2] sm:$0xff]  ;;  %v171_v60 = vshrl.u32 %v170_v59, 7 }
  0x4b   :  { %v483_v11 = vpack.c.bf16 %v156_v9, %v155_v7  ;;  %v157_v12 = vld [vmem:[#allocation6 + $0x20] sm:$0xff]  ;;  %v158_v13 = vld [vmem:[#allocation6 + $0x28] sm:$0xff]  ;;  %v159_v15 = vld [vmem:[#allocation6 + $0x30] sm:$0xff] }
  0x4c   :  { %478 = vmatpush3.bf16.msra.mxu0 %v477_v4  ;;  %481 = vmatpush3.bf16.msra.mxu1 %v480_v8  ;;  %v486_v14 = vpack.c.bf16 %v158_v13, %v157_v12  ;;  %v160_v16 = vld [vmem:[#allocation6 + $0x38] sm:$0xff]  ;;  %v161_v18 = vld [vmem:[#allocation6 + $0x40] sm:$0xff]  ;;  %v162_v19 = vld [vmem:[#allocation6 + $0x48] sm:$0xff]  ;;  %v172_v61 = vsub.s32 0, %v171_v60 }
  0x4d   :  { %503 = vmatprep.subr.bf16.mxu0 %v640_v0  ;;  %482 = vmatprep.subr.bf16.mxu1 %v640_v0  ;;  %v489_v17 = vpack.c.bf16 %v160_v16, %v159_v15  ;;  %v492_v20 = vpack.c.bf16 %v162_v19, %v161_v18  ;;  %v163_v21 = vld [vmem:[#allocation6 + $0x50] sm:$0xff]  ;;  %v164_v22 = vld [vmem:[#allocation6 + $0x58] sm:$0xff]  ;;  %v165_v24 = vld [vmem:[#allocation6 + $0x60] sm:$0xff] }
  0x4e   :  { %v495_v23 = vpack.c.bf16 %v164_v22, %v163_v21  ;;  %v166_v25 = vld [vmem:[#allocation6 + $0x68] sm:$0xff]  ;;  %v167_v27 = vld [vmem:[#allocation6 + $0x70] sm:$0xff]  ;;  %v168_v28 = vld [vmem:[#allocation6 + $0x78] sm:$0xff] }
  0x4f   :  { %404 = vmatmul.mubr.msk.f32.vlgmr.msra.gmra.mrb[0].mxu0 %vm78_vm1, %v70_v10  ;;  %v498_v26 = vpack.c.bf16 %v166_v25, %v165_v24  ;;  %v501_v29 = vpack.c.bf16 %v168_v28, %v167_v27  ;;  %v245_v30 = vld [vmem:[#allocation7] sm:$0xff]  ;;  %v246_v31 = vld [vmem:[#allocation7 + $0x8] sm:$0xff]  ;;  %v247_v32 = vld [vmem:[#allocation7 + $0x10] sm:$0xff] }
  0x50   :  { %473 = vmatprep.mubr.msk.f32.mxu0 %vm641_vm0, %v642_v1  ;;  %484 = vmatpush3.bf16.msra.mxu1 %v483_v11  ;;  %v504_v33 = vpack.c.bf16 %v246_v31, %v245_v30  ;;  %v248_v34 = vld [vmem:[#allocation7 + $0x18] sm:$0xff]  ;;  %v249_v36 = vld [vmem:[#allocation7 + $0x20] sm:$0xff]  ;;  %v250_v37 = vld [vmem:[#allocation7 + $0x28] sm:$0xff] }
  0x51   :  { %485 = vmatprep.subr.bf16.mxu1 %v640_v0  ;;  %v507_v35 = vpack.c.bf16 %v248_v34, %v247_v32  ;;  %v510_v38 = vpack.c.bf16 %v250_v37, %v249_v36  ;;  %v251_v39 = vld [vmem:[#allocation7 + $0x30] sm:$0xff]  ;;  %v252_v40 = vld [vmem:[#allocation7 + $0x38] sm:$0xff]  ;;  %v253_v42 = vld [vmem:[#allocation7 + $0x40] sm:$0xff] }
  0x52   :  { %505 = vmatpush3.bf16.msra.mxu0 %v504_v33  ;;  %v513_v41 = vpack.c.bf16 %v252_v40, %v251_v39  ;;  %v254_v43 = vld [vmem:[#allocation7 + $0x48] sm:$0xff]  ;;  %v255_v45 = vld [vmem:[#allocation7 + $0x50] sm:$0xff]  ;;  %v256_v46 = vld [vmem:[#allocation7 + $0x58] sm:$0xff] }
  0x53   :  { %506 = vmatprep.subr.bf16.mxu0 %v640_v0  ;;  %v516_v44 = vpack.c.bf16 %v254_v43, %v253_v42  ;;  %v519_v47 = vpack.c.bf16 %v256_v46, %v255_v45  ;;  %v257_v48 = vld [vmem:[#allocation7 + $0x60] sm:$0xff]  ;;  %v258_v49 = vld [vmem:[#allocation7 + $0x68] sm:$0xff]  ;;  %v359_v51 = vld [vmem:[#allocation4 + $0x10] ss:$0 sm:$0xff] }
  0x54   :  { %487 = vmatpush3.bf16.msra.mxu1 %v486_v14  ;;  %v522_v50 = vpack.c.bf16 %v258_v49, %v257_v48  ;;  %v259_v56 = vld [vmem:[#allocation7 + $0x70] sm:$0xff]  ;;  %v260_v57 = vld [vmem:[#allocation7 + $0x78] sm:$0xff]  ;;  %v361_v5 = vld [vmem:[#allocation7 + $0x80] ss:$0 sm:$0xff] }
  0x55   :  { %488 = vmatprep.subr.bf16.mxu1 %v640_v0  ;;  %v525_v58 = vpack.c.bf16 %v260_v57, %v259_v56  ;;  %v169_v62 = vld [vmem:[#allocation6 + $0x80] sm:$0xff] }
  0x56   :  { %508 = vmatpush3.bf16.msra.mxu0 %v507_v35  ;;  %v173_v63 = vrot.slane %v169_v62, %v172_v61 }
  0x57   :  { %509 = vmatprep.subr.bf16.mxu0 %v640_v0 }
  0x58   :  { %490 = vmatpush3.bf16.msra.mxu1 %v489_v17 }
  0x59   :  { %491 = vmatprep.subr.bf16.mxu1 %v640_v0 }
  0x5a   :  { %511 = vmatpush3.bf16.msra.mxu0 %v510_v38 }
  0x5b   :  { %512 = vmatprep.subr.bf16.mxu0 %v640_v0 }
  0x5c   :  { %493 = vmatpush3.bf16.msra.mxu1 %v492_v20 }
  0x5d   :  { %494 = vmatprep.subr.bf16.mxu1 %v640_v0 }
  0x5e   :  { %514 = vmatpush3.bf16.msra.mxu0 %v513_v41 }
  0x5f   :  { %515 = vmatprep.subr.bf16.mxu0 %v640_v0 }
  0x60   :  { %496 = vmatpush3.bf16.msra.mxu1 %v495_v23 }
  0x61   :  { %497 = vmatprep.subr.bf16.mxu1 %v640_v0 }
  0x62   :  { %517 = vmatpush3.bf16.msra.mxu0 %v516_v44 }
  0x63   :  { %518 = vmatprep.subr.bf16.mxu0 %v640_v0 }
  0x64   :  { %499 = vmatpush3.bf16.msra.mxu1 %v498_v26 }
  0x65   :  { %500 = vmatprep.subr.bf16.mxu1 %v640_v0 }
  0x66   :  { %520 = vmatpush3.bf16.msra.mxu0 %v519_v47 }
  0x67   :  { %521 = vmatprep.subr.bf16.mxu0 %v640_v0 }
  0x68   :  { %502 = vmatpush3.bf16.msra.mxu1 %v501_v29 }
  0x6a   :  { %523 = vmatpush3.bf16.msra.mxu0 %v522_v50 }
  0x6b   :  { %524 = vmatprep.subr.bf16.mxu0 %v640_v0  ;;  %v337_v0 = vand.u32 127, %v170_v59 }
  0x6d   :  { %vm338_vm2 = vcmp.lt.s32.totalorder %v337_v0, 4  ;;  %vm349_vm3 = vcmp.eq.s32.totalorder %v337_v0, 4 }
  0x6e   :  { %526 = vmatpush3.bf16.msra.mxu0 %v525_v58 }
 0x122   :  { %v148_v52 = vpop.f32.mrb[0].mxu0 }
 0x123   :  { %v149_v53 = vadd.f32 %v359_v51, %v148_v52  ;;  %v405_v54 = vpop.f32.mrb[1].mxu0 }
 0x125   :  { %v152_v55 = vmax.f32 %v149_v53, 0.0 }
 0x127   :  { %439 = vmatmul.mubr.f32.vlgmr.msra.gmra.mrb[0].mxu1 %v152_v55 }
 0x1fa   :  { %v240_v1 = vpop.f32.mrb[0].mxu1 }
 0x1fb   :  { %v241_v2 = vadd.f32 %v240_v1, %v173_v63  ;;  %v440_v3 = vpop.f32.mrb[1].mxu1 }
 0x1fd   :  { %v244_v4 = vmax.f32 %v241_v2, 0.0 }
 0x1ff   :  { %474 = vmatmul.mubr.f32.vlgmr.msra.gmra.mrb[2].mxu0 %v244_v4 }
 0x2d2   :  { %v332_v6 = vpop.f32.mrb[2].mxu0 }
 0x2d3   :  { %v333_v7 = vadd.f32 %v361_v5, %v332_v6  ;;  %v475_v8 = vpop.f32.mrb[3].mxu0 }
 0x2d5   :  { %v339_v9 = vsel %vm338_vm2, %v333_v7, -1e+30 }
 0x2d6   :  { %340 = vmax.xlane.f32.xlu0 %v339_v9 }
 0x363   :  { %v341_v10 = vpop.xlane.xlu0 %340 }
 0x364   :  { %v342_v11 = vsub.f32 %v339_v9, %v341_v10 }
 0x366   :  { %v343_v12 = vmul.f32 1.442695, %v342_v11 }
 0x368   :  { %536 = vpow2.f32 %v343_v12 }
 0x372   :  { %v537_v13 = vpop.eup %536 }
 0x373   :  { %345 = vadd.xlane.f32.xlu0 %v537_v13 }
 0x400   :  { %v346_v14 = vpop.xlane.xlu0 %345 }
 0x401   :  { %538 = vrcp.f32 %v346_v14 }
 0x40b   :  { %v539_v15 = vpop.eup %538 }
 0x40c   :  { %v348_v16 = vmul.f32 %v539_v15, %v537_v13 }
 0x40e   :  { %v350_v17 = vsel %vm349_vm3, %v333_v7, %v348_v16 }
 0x40f   :  { %351 = vst [vmem:[%s752_s4] sm:$0xff] %v350_v17 }
 0x410   :  { %356 = vsyncpa [#allocation3], 1 }
 0x411   :  { %357 = vsyncpa [#allocation5], 1 }
 0x412   :  { %358 = vsyncpa [#allocation8], 1 }

// kernel: policy_value_forward.1
= control target key start
LH: loop header
LB: loop body
LE: loop exit
PB: predicated region body
PF: predicated region fallthrough
CT: control target
= control target key end

     0   :  { %9 = vsyncpa [#allocation3], 0  ;;  %s748_s0 = inlined_call_operand.hbm [shape: f32[8,16], index: 0, kind: input, shape index: {}]   ;;  %s749_s1 = inlined_call_operand.hbm [shape: f32[24,128], index: 1, kind: input, shape index: {}]   ;;  %s750_s2 = inlined_call_operand.hbm [shape: f32[1,136,128], index: 2, kind: input, shape index: {}]   ;;  %s751_s3 = inlined_call_operand.hbm [shape: f32[136,128], index: 3, kind: input, shape index: {}]   ;;  %s752_s4 = inlined_call_operand.vmem [shape: f32[8,128], index: 4, kind: output, shape index: {}]  }
   0x1   :  { %10 = vsyncpa [#allocation5], 0 }
   0x2   :  { %11 = vsyncpa [#allocation8], 0  ;;  %s634_s15 = smov [#allocation4]   ;;  %s540_s19 = scalar_lea.hbm %s749_s1, 384 }
   0x3   :  { %s27_s16 = sshll.u32 %s634_s15, 4  ;;  %p541_p0 = scmp.ne.s32.totalorder %s749_s1, %s540_s19  ;;  %s28_s16 = int_to_ptr.vmem [resolvable:$true] %s27_s16 }
   0x4   :  { %p544_p1 = scmp.lt.u32.totalorder %s540_s19, %s749_s1 }
   0x6   :  { %p546_p2 = pnand %p544_p1, %p541_p0 }
   0x8   :  { %549 = shalt.err (!%p546_p2)
}
   0x9   :  { %s550_s24 = scalar_lea.vmem %s28_s16, 384  ;;  %p555_p4 = scmp.lt.s32.totalorder %s28_s16, %s28_s16 }
   0xa   :  { %p551_p3 = scmp.ne.s32.totalorder %s28_s16, %s550_s24  ;;  %p556_p5 = scmp.lt.s32.totalorder %s550_s24, %s550_s24 }
   0xc   :  { %p557_p6 = por %p556_p5, %p555_p4 }
   0xe   :  { %p558_p7 = pnand %p557_p6, %p551_p3 }
  0x10   :  { %561 = shalt.err (!%p558_p7)
}
  0x11   :  { %s635_s25 = smov 128   ;;  %s636_s26 = smov 8  }
  0x12   :  { %33 = dma.hbm_to_vmem [thread:$0]  %s749_s1, 384, %s28_s16, [#allocation5], %s635_s25, %s635_s25, %s636_s26  }
  0x13   :  { %s637_s29 = smov [#allocation2]   ;;  %s638_s5 = smov [#allocation6]  }
  0x14   :  { %s18_s30 = sshll.u32 %s637_s29, 4  ;;  %s39_s6 = sshll.u32 %s638_s5, 4  ;;  %s19_s30 = int_to_ptr.vmem [resolvable:$true] %s18_s30  ;;  %s40_s6 = int_to_ptr.vmem [resolvable:$true] %s39_s6 }
  0x15   :  { %s562_s9 = scalar_lea.hbm %s748_s0, 128 }
  0x16   :  { %p563_p8 = scmp.ne.s32.totalorder %s748_s0, %s562_s9  ;;  %p566_p9 = scmp.lt.u32.totalorder %s562_s9, %s748_s0 }
  0x18   :  { %p568_p10 = pnand %p566_p9, %p563_p8 }
  0x1a   :  { %571 = shalt.err (!%p568_p10)
}
  0x1b   :  { %s572_s1 = scalar_lea.vmem %s19_s30, 128  ;;  %p577_p12 = scmp.lt.s32.totalorder %s19_s30, %s19_s30 }
  0x1c   :  { %p573_p11 = scmp.ne.s32.totalorder %s19_s30, %s572_s1  ;;  %p578_p13 = scmp.lt.s32.totalorder %s572_s1, %s572_s1 }
  0x1e   :  { %p579_p0 = por %p578_p13, %p577_p12 }
  0x20   :  { %p580_p1 = pnand %p579_p0, %p573_p11 }
  0x22   :  { %583 = shalt.err (!%p580_p1)
}
  0x23   :  { %21 = dma.hbm_to_vmem [thread:$0]  %s748_s0, 128, %s19_s30, [#allocation3]  }
  0x24   :  { %s584_s18 = scalar_lea.hbm %s750_s2, 2176 }
  0x25   :  { %p585_p2 = scmp.ne.s32.totalorder %s750_s2, %s584_s18  ;;  %p588_p3 = scmp.lt.u32.totalorder %s584_s18, %s750_s2 }
  0x27   :  { %p590_p4 = pnand %p588_p3, %p585_p2 }
  0x29   :  { %593 = shalt.err (!%p590_p4)
}
  0x2a   :  { %s594_s23 = scalar_lea.vmem %s40_s6, 2176  ;;  %p599_p6 = scmp.lt.s32.totalorder %s40_s6, %s40_s6 }
  0x2b   :  { %p595_p5 = scmp.ne.s32.totalorder %s40_s6, %s594_s23  ;;  %p600_p7 = scmp.lt.s32.totalorder %s594_s23, %s594_s23 }
  0x2d   :  { %p601_p8 = por %p600_p7, %p599_p6 }
  0x2f   :  { %p602_p9 = pnand %p601_p8, %p595_p5 }
  0x31   :  { %605 = shalt.err (!%p602_p9)
}
  0x32   :  { %45 = dma.hbm_to_vmem [thread:$0]  %s750_s2, 2176, %s40_s6, [#allocation5], %s635_s25, %s635_s25, %s636_s26  }
  0x33   :  { %s639_s27 = smov [#allocation7]   ;;  %s606_s5 = scalar_lea.hbm %s751_s3, 2176 }
  0x34   :  { %s51_s28 = sshll.u32 %s639_s27, 4  ;;  %p607_p10 = scmp.ne.s32.totalorder %s751_s3, %s606_s5  ;;  %s52_s28 = int_to_ptr.vmem [resolvable:$true] %s51_s28 }
  0x35   :  { %p610_p11 = scmp.lt.u32.totalorder %s606_s5, %s751_s3 }
  0x37   :  { %p612_p12 = pnand %p610_p11, %p607_p10 }
  0x39   :  { %615 = shalt.err (!%p612_p12)
}
  0x3a   :  { %s616_s11 = scalar_lea.vmem %s52_s28, 2176  ;;  %p621_p0 = scmp.lt.s32.totalorder %s52_s28, %s52_s28 }
  0x3b   :  { %p617_p13 = scmp.ne.s32.totalorder %s52_s28, %s616_s11  ;;  %p622_p1 = scmp.lt.s32.totalorder %s616_s11, %s616_s11 }
  0x3d   :  { %p623_p2 = por %p622_p1, %p621_p0 }
  0x3f   :  { %p624_p3 = pnand %p623_p2, %p617_p13 }
  0x41   :  { %627 = shalt.err (!%p624_p3)
}
  0x42   :  { %57 = dma.hbm_to_vmem [thread:$0]  %s751_s3, 2176, %s52_s28, [#allocation8], %s635_s25, %s635_s25, %s636_s26  }
  0x43   :  { %628 = dma.done.wait [#allocation3], 128  }
  0x44   :  { %629 = vsyncadd [#allocation3], 4294967168 }
  0x45   :  { %630 = dma.done.wait [#allocation5], 2560  }
  0x46   :  { %631 = vsyncadd [#allocation5], 4294964736 }
  0x47   :  { %632 = dma.done.wait [#allocation8], 2176  }
  0x48   :  { %633 = vsyncadd [#allocation8], 4294965120  ;;  %v640_v0 = vmov 0.0|0.0   ;;  %vm641_vm0 = vmmov 0   ;;  %v642_v1 = vmov 0.0   ;;  %v71_v2 = vld [vmem:[#allocation4] sm:$0xff]  ;;  %v170_v59 = vlaneseq }
  0x49   :  { %476 = vmatprep.subr.bf16.mxu0 %v640_v0  ;;  %403 = vmatprep.mubr.msk.f32.mxu0 %vm641_vm0, %v642_v1  ;;  %v72_v3 = vld [vmem:[#allocation4 + $0x8] sm:$0xff]  ;;  %v153_v5 = vld [vmem:[#allocation6] sm:$0xff]  ;;  %v154_v6 = vld [vmem:[#allocation6 + $0x8] sm:$0xff]  ;;  %vm78_vm1 = vcmask 130048  }
  0x4a   :  { %479 = vmatprep.subr.bf16.mxu1 %v640_v0  ;;  %438 = vmatprep.mubr.msk.f32.mxu1 %vm641_vm0, %v642_v1  ;;  %v477_v4 = vpack.c.bf16 %v72_v3, %v71_v2  ;;  %v155_v7 = vld [vmem:[#allocation6 + $0x10] sm:$0xff]  ;;  %v480_v8 = vpack.c.bf16 %v154_v6, %v153_v5  ;;  %v156_v9 = vld [vmem:[#allocation6 + $0x18] sm:$0xff]  ;;  %v70_v10 = vld [vmem:[#allocation2] sm:$0xff]  ;;  %v171_v60 = vshrl.u32 %v170_v59, 7 }
  0x4b   :  { %v483_v11 = vpack.c.bf16 %v156_v9, %v155_v7  ;;  %v157_v12 = vld [vmem:[#allocation6 + $0x20] sm:$0xff]  ;;  %v158_v13 = vld [vmem:[#allocation6 + $0x28] sm:$0xff]  ;;  %v159_v15 = vld [vmem:[#allocation6 + $0x30] sm:$0xff] }
  0x4c   :  { %478 = vmatpush3.bf16.msra.mxu0 %v477_v4  ;;  %481 = vmatpush3.bf16.msra.mxu1 %v480_v8  ;;  %v486_v14 = vpack.c.bf16 %v158_v13, %v157_v12  ;;  %v160_v16 = vld [vmem:[#allocation6 + $0x38] sm:$0xff]  ;;  %v161_v18 = vld [vmem:[#allocation6 + $0x40] sm:$0xff]  ;;  %v162_v19 = vld [vmem:[#allocation6 + $0x48] sm:$0xff]  ;;  %v172_v61 = vsub.s32 0, %v171_v60 }
  0x4d   :  { %503 = vmatprep.subr.bf16.mxu0 %v640_v0  ;;  %482 = vmatprep.subr.bf16.mxu1 %v640_v0  ;;  %v489_v17 = vpack.c.bf16 %v160_v16, %v159_v15  ;;  %v492_v20 = vpack.c.bf16 %v162_v19, %v161_v18  ;;  %v163_v21 = vld [vmem:[#allocation6 + $0x50] sm:$0xff]  ;;  %v164_v22 = vld [vmem:[#allocation6 + $0x58] sm:$0xff]  ;;  %v165_v24 = vld [vmem:[#allocation6 + $0x60] sm:$0xff] }
  0x4e   :  { %v495_v23 = vpack.c.bf16 %v164_v22, %v163_v21  ;;  %v166_v25 = vld [vmem:[#allocation6 + $0x68] sm:$0xff]  ;;  %v167_v27 = vld [vmem:[#allocation6 + $0x70] sm:$0xff]  ;;  %v168_v28 = vld [vmem:[#allocation6 + $0x78] sm:$0xff] }
  0x4f   :  { %404 = vmatmul.mubr.msk.f32.vlgmr.msra.gmra.mrb[0].mxu0 %vm78_vm1, %v70_v10  ;;  %v498_v26 = vpack.c.bf16 %v166_v25, %v165_v24  ;;  %v501_v29 = vpack.c.bf16 %v168_v28, %v167_v27  ;;  %v245_v30 = vld [vmem:[#allocation7] sm:$0xff]  ;;  %v246_v31 = vld [vmem:[#allocation7 + $0x8] sm:$0xff]  ;;  %v247_v32 = vld [vmem:[#allocation7 + $0x10] sm:$0xff] }
  0x50   :  { %473 = vmatprep.mubr.msk.f32.mxu0 %vm641_vm0, %v642_v1  ;;  %484 = vmatpush3.bf16.msra.mxu1 %v483_v11  ;;  %v504_v33 = vpack.c.bf16 %v246_v31, %v245_v30  ;;  %v248_v34 = vld [vmem:[#allocation7 + $0x18] sm:$0xff]  ;;  %v249_v36 = vld [vmem:[#allocation7 + $0x20] sm:$0xff]  ;;  %v250_v37 = vld [vmem:[#allocation7 + $0x28] sm:$0xff] }
  0x51   :  { %485 = vmatprep.subr.bf16.mxu1 %v640_v0  ;;  %v507_v35 = vpack.c.bf16 %v248_v34, %v247_v32  ;;  %v510_v38 = vpack.c.bf16 %v250_v37, %v249_v36  ;;  %v251_v39 = vld [vmem:[#allocation7 + $0x30] sm:$0xff]  ;;  %v252_v40 = vld [vmem:[#allocation7 + $0x38] sm:$0xff]  ;;  %v253_v42 = vld [vmem:[#allocation7 + $0x40] sm:$0xff] }
  0x52   :  { %505 = vmatpush3.bf16.msra.mxu0 %v504_v33  ;;  %v513_v41 = vpack.c.bf16 %v252_v40, %v251_v39  ;;  %v254_v43 = vld [vmem:[#allocation7 + $0x48] sm:$0xff]  ;;  %v255_v45 = vld [vmem:[#allocation7 + $0x50] sm:$0xff]  ;;  %v256_v46 = vld [vmem:[#allocation7 + $0x58] sm:$0xff] }
  0x53   :  { %506 = vmatprep.subr.bf16.mxu0 %v640_v0  ;;  %v516_v44 = vpack.c.bf16 %v254_v43, %v253_v42  ;;  %v519_v47 = vpack.c.bf16 %v256_v46, %v255_v45  ;;  %v257_v48 = vld [vmem:[#allocation7 + $0x60] sm:$0xff]  ;;  %v258_v49 = vld [vmem:[#allocation7 + $0x68] sm:$0xff]  ;;  %v359_v51 = vld [vmem:[#allocation4 + $0x10] ss:$0 sm:$0xff] }
  0x54   :  { %487 = vmatpush3.bf16.msra.mxu1 %v486_v14  ;;  %v522_v50 = vpack.c.bf16 %v258_v49, %v257_v48  ;;  %v259_v56 = vld [vmem:[#allocation7 + $0x70] sm:$0xff]  ;;  %v260_v57 = vld [vmem:[#allocation7 + $0x78] sm:$0xff]  ;;  %v361_v5 = vld [vmem:[#allocation7 + $0x80] ss:$0 sm:$0xff] }
  0x55   :  { %488 = vmatprep.subr.bf16.mxu1 %v640_v0  ;;  %v525_v58 = vpack.c.bf16 %v260_v57, %v259_v56  ;;  %v169_v62 = vld [vmem:[#allocation6 + $0x80] sm:$0xff] }
  0x56   :  { %508 = vmatpush3.bf16.msra.mxu0 %v507_v35  ;;  %v173_v63 = vrot.slane %v169_v62, %v172_v61 }
  0x57   :  { %509 = vmatprep.subr.bf16.mxu0 %v640_v0 }
  0x58   :  { %490 = vmatpush3.bf16.msra.mxu1 %v489_v17 }
  0x59   :  { %491 = vmatprep.subr.bf16.mxu1 %v640_v0 }
  0x5a   :  { %511 = vmatpush3.bf16.msra.mxu0 %v510_v38 }
  0x5b   :  { %512 = vmatprep.subr.bf16.mxu0 %v640_v0 }
  0x5c   :  { %493 = vmatpush3.bf16.msra.mxu1 %v492_v20 }
  0x5d   :  { %494 = vmatprep.subr.bf16.mxu1 %v640_v0 }
  0x5e   :  { %514 = vmatpush3.bf16.msra.mxu0 %v513_v41 }
  0x5f   :  { %515 = vmatprep.subr.bf16.mxu0 %v640_v0 }
  0x60   :  { %496 = vmatpush3.bf16.msra.mxu1 %v495_v23 }
  0x61   :  { %497 = vmatprep.subr.bf16.mxu1 %v640_v0 }
  0x62   :  { %517 = vmatpush3.bf16.msra.mxu0 %v516_v44 }
  0x63   :  { %518 = vmatprep.subr.bf16.mxu0 %v640_v0 }
  0x64   :  { %499 = vmatpush3.bf16.msra.mxu1 %v498_v26 }
  0x65   :  { %500 = vmatprep.subr.bf16.mxu1 %v640_v0 }
  0x66   :  { %520 = vmatpush3.bf16.msra.mxu0 %v519_v47 }
  0x67   :  { %521 = vmatprep.subr.bf16.mxu0 %v640_v0 }
  0x68   :  { %502 = vmatpush3.bf16.msra.mxu1 %v501_v29 }
  0x6a   :  { %523 = vmatpush3.bf16.msra.mxu0 %v522_v50 }
  0x6b   :  { %524 = vmatprep.subr.bf16.mxu0 %v640_v0  ;;  %v337_v0 = vand.u32 127, %v170_v59 }
  0x6d   :  { %vm338_vm2 = vcmp.lt.s32.totalorder %v337_v0, 4  ;;  %vm349_vm3 = vcmp.eq.s32.totalorder %v337_v0, 4 }
  0x6e   :  { %526 = vmatpush3.bf16.msra.mxu0 %v525_v58 }
 0x122   :  { %v148_v52 = vpop.f32.mrb[0].mxu0 }
 0x123   :  { %v149_v53 = vadd.f32 %v359_v51, %v148_v52  ;;  %v405_v54 = vpop.f32.mrb[1].mxu0 }
 0x125   :  { %v152_v55 = vmax.f32 %v149_v53, 0.0 }
 0x127   :  { %439 = vmatmul.mubr.f32.vlgmr.msra.gmra.mrb[0].mxu1 %v152_v55 }
 0x1fa   :  { %v240_v1 = vpop.f32.mrb[0].mxu1 }
 0x1fb   :  { %v241_v2 = vadd.f32 %v240_v1, %v173_v63  ;;  %v440_v3 = vpop.f32.mrb[1].mxu1 }
 0x1fd   :  { %v244_v4 = vmax.f32 %v241_v2, 0.0 }
 0x1ff   :  { %474 = vmatmul.mubr.f32.vlgmr.msra.gmra.mrb[2].mxu0 %v244_v4 }
 0x2d2   :  { %v332_v6 = vpop.f32.mrb[2].mxu0 }
 0x2d3   :  { %v333_v7 = vadd.f32 %v361_v5, %v332_v6  ;;  %v475_v8 = vpop.f32.mrb[3].mxu0 }
 0x2d5   :  { %v339_v9 = vsel %vm338_vm2, %v333_v7, -1e+30 }
 0x2d6   :  { %340 = vmax.xlane.f32.xlu0 %v339_v9 }
 0x363   :  { %v341_v10 = vpop.xlane.xlu0 %340 }
 0x364   :  { %v342_v11 = vsub.f32 %v339_v9, %v341_v10 }
 0x366   :  { %v343_v12 = vmul.f32 1.442695, %v342_v11 }
 0x368   :  { %536 = vpow2.f32 %v343_v12 }
 0x372   :  { %v537_v13 = vpop.eup %536 }
 0x373   :  { %345 = vadd.xlane.f32.xlu0 %v537_v13 }
 0x400   :  { %v346_v14 = vpop.xlane.xlu0 %345 }
 0x401   :  { %538 = vrcp.f32 %v346_v14 }
 0x40b   :  { %v539_v15 = vpop.eup %538 }
 0x40c   :  { %v348_v16 = vmul.f32 %v539_v15, %v537_v13 }
 0x40e   :  { %v350_v17 = vsel %vm349_vm3, %v333_v7, %v348_v16 }
 0x40f   :  { %351 = vst [vmem:[%s752_s4] sm:$0xff] %v350_v17 }
 0x410   :  { %356 = vsyncpa [#allocation3], 1 }
 0x411   :  { %357 = vsyncpa [#allocation5], 1 }
 0x412   :  { %358 = vsyncpa [#allocation8], 1 }

</bundles_post_ra>
